<compile_context>
chip_gen: v7x
topology: tpu7x:2x2x1
jax: 0.10.0
libtpu: 0.0.40
codegen_flags: <defaults>
</compile_context>

<pallas_src>
import functools

import jax
import jax.numpy as jnp
from jax.experimental import pallas as pl
from jax.experimental.pallas import tpu as pltpu

_LANES = 128
_SUBLANES = 8


def _hidden_kernel(x_ref, wt_ref, b_ref, o_ref):
    # x_ref : (TB, 1)   wt_ref : (1, Hp)   b_ref : (1, Hp)   o_ref : (TB, Hp)
    x = x_ref[...]          # (TB, 1)
    wt = wt_ref[...]        # (1, Hp)
    b = b_ref[...]          # (1, Hp)
    # K=1 linear == outer product: pure VPU broadcast multiply-add, then ReLU.
    y = x * wt + b          # (TB, Hp)
    o_ref[...] = jnp.maximum(y, 0.0).astype(o_ref.dtype)


def _round_up(n, m):
    return ((n + m - 1) // m) * m


@functools.partial(jax.jit, static_argnames=("tb",))
def hidden_forward(x, weight, bias, *, tb=None):
    """ReLU(x @ weight.T + bias).

    x: (B, 1) f32, weight: (n_hidden, 1) f32, bias: (n_hidden,) f32.
    Returns (B, n_hidden) f32.
    """
    B = x.shape[0]
    H = weight.shape[0]
    dtype = x.dtype

    # --- lane-dense padding of the hidden dim (multiple of 128) ------------
    Hp = _round_up(H, _LANES)
    wt = jnp.zeros((1, Hp), dtype).at[0, :H].set(weight[:, 0].astype(dtype))
    b2 = jnp.zeros((1, Hp), dtype).at[0, :H].set(bias.astype(dtype))

    # --- batch tile: multiple of 8 sublanes, sized to stay well under the
    # scoped-VMEM default on every generation (double-buffered out tile).
    if tb is None:
        budget_bytes = 8 * 1024 * 1024          # per double-buffered out tile
        tb_max = max(_SUBLANES,
                     (budget_bytes // (Hp * 4 * 2)) // _SUBLANES * _SUBLANES)
        tb = min(tb_max, 2048, _round_up(B, _SUBLANES))
    TB = max(_SUBLANES, _round_up(tb, _SUBLANES))

    Bp = _round_up(B, TB)
    if Bp != B:
        x = jnp.pad(x, ((0, Bp - B), (0, 0)))   # padded rows sliced off below

    out = pl.pallas_call(
        _hidden_kernel,
        out_shape=jax.ShapeDtypeStruct((Bp, Hp), dtype),
        grid_spec=pl.GridSpec(
            grid=(Bp // TB,),
            in_specs=[
                pl.BlockSpec((TB, 1), lambda i: (i, 0)),    # x tile
                pl.BlockSpec((1, Hp), lambda i: (0, 0)),    # w^T (resident)
                pl.BlockSpec((1, Hp), lambda i: (0, 0)),    # bias (resident)
            ],
            out_specs=pl.BlockSpec((TB, Hp), lambda i: (i, 0)),
        ),
        compiler_params=pltpu.CompilerParams(
            dimension_semantics=("parallel",),
            vmem_limit_bytes=64 * 1024 * 1024,
        ),
    )(x, wt, b2)

    return out[:B, :H]


def make_hidden_params(n_hidden, grid=True):
    """Deterministic parameter init matching Hidden.__init__(n_hidden, grid=True)."""
    if grid:
        # weight[::2] = 1, weight[1::2] = -1   (shape (n_hidden, 1))
        signs = jnp.where(jnp.arange(n_hidden) % 2 == 0, 1.0, -1.0)
        weight = signs.reshape(n_hidden, 1).astype(jnp.float32)
        # bias = -weight[:, 0] * linspace(-1, 1, n_hidden)
        bias = (-weight[:, 0] * jnp.linspace(-1.0, 1.0, n_hidden)).astype(jnp.float32)
    else:
        # Deterministic stand-in for PyTorch's default uniform init.
        k = jax.random.PRNGKey(42)
        kw, kb = jax.random.split(k)
        bound = 1.0  # 1/sqrt(in_features), in_features = 1
        weight = jax.random.uniform(kw, (n_hidden, 1), jnp.float32, -bound, bound)
        bias = jax.random.uniform(kb, (n_hidden,), jnp.float32, -bound, bound)
    return weight, bias


if __name__ == "__main__":
    batch = 8
    n_hidden = 32

    key = jax.random.PRNGKey(0)
    x = jax.random.normal(key, (batch, 1), dtype=jnp.float32)

    weight, bias = make_hidden_params(n_hidden, grid=True)

    out = hidden_forward(x, weight, bias)
    out = jax.block_until_ready(out)

    # Reference check (plain JAX) — same math as the PyTorch module.
    ref = jnp.maximum(x @ weight.T + bias, 0.0)
    assert out.shape == (batch, n_hidden)
    assert jnp.allclose(out, ref, atol=1e-5, rtol=1e-5)

    print("KERNEL_OK")
</pallas_src>

<mosaic_0001>
module attributes {stable_mosaic.version = 11 : i64} {
  func.func @_hidden_kernel(%arg0: i32, %arg1: memref<8x1xf32, #tpu.memory_space<vmem>>, %arg2: memref<1x128xf32, #tpu.memory_space<vmem>>, %arg3: memref<1x128xf32, #tpu.memory_space<vmem>>, %arg4: memref<8x128xf32, #tpu.memory_space<vmem>>) attributes {dimension_semantics = [#tpu.dimension_semantics<parallel>], iteration_bounds = array<i64: 1>, scalar_prefetch = 0 : i64, scratch_operands = 0 : i64, tpu.core_type = #tpu.core_type<tc>, window_params = [{transform_indices = @transform_0, window_bounds = array<i64: 8, 1>}, {pipeline_mode = #tpu.pipeline_mode<synchronous>, transform_indices = @transform_1, window_bounds = array<i64: 1, 128>}, {pipeline_mode = #tpu.pipeline_mode<synchronous>, transform_indices = @transform_2, window_bounds = array<i64: 1, 128>}, {transform_indices = @transform_3, window_bounds = array<i64: 8, 128>}]} {
    %c0 = arith.constant 0 : index
    %c0_0 = arith.constant 0 : index
    %0 = vector.load %arg1[%c0, %c0_0] : memref<8x1xf32, #tpu.memory_space<vmem>>, vector<8x1xf32>
    %c0_1 = arith.constant 0 : index
    %c0_2 = arith.constant 0 : index
    %1 = vector.load %arg2[%c0_1, %c0_2] : memref<1x128xf32, #tpu.memory_space<vmem>>, vector<1x128xf32>
    %c0_3 = arith.constant 0 : index
    %c0_4 = arith.constant 0 : index
    %2 = vector.load %arg3[%c0_3, %c0_4] : memref<1x128xf32, #tpu.memory_space<vmem>>, vector<1x128xf32>
    %3 = vector.broadcast %0 : vector<8x1xf32> to vector<8x128xf32>
    %4 = vector.broadcast %1 : vector<1x128xf32> to vector<8x128xf32>
    %5 = arith.mulf %3, %4 : vector<8x128xf32>
    %6 = vector.broadcast %2 : vector<1x128xf32> to vector<8x128xf32>
    %7 = arith.addf %5, %6 : vector<8x128xf32>
    %cst = arith.constant 0.000000e+00 : f32
    %8 = vector.broadcast %cst : f32 to vector<8x128xf32>
    %9 = arith.maximumf %7, %8 : vector<8x128xf32>
    %c0_5 = arith.constant 0 : index
    %c0_6 = arith.constant 0 : index
    %10 = vector.load %arg4[%c0_5, %c0_6] : memref<8x128xf32, #tpu.memory_space<vmem>>, vector<8x128xf32>
    tpu.vector_store %arg4[%c0_5, %c0_6], %9 {strides = array<i32>} : memref<8x128xf32, #tpu.memory_space<vmem>>, vector<8x128xf32>,
    return
  }
  func.func @transform_0(%arg0: i32) -> (i32, i32) {
    %c0_i32 = arith.constant 0 : i32
    %c0_i32_0 = arith.constant 0 : i32
    return %arg0, %c0_i32 : i32, i32
  }
  func.func @transform_1(%arg0: i32) -> (i32, i32) {
    %c0_i32 = arith.constant 0 : i32
    %c0_i32_0 = arith.constant 0 : i32
    %c0_i32_1 = arith.constant 0 : i32
    return %c0_i32, %c0_i32_0 : i32, i32
  }
  func.func @transform_2(%arg0: i32) -> (i32, i32) {
    %c0_i32 = arith.constant 0 : i32
    %c0_i32_0 = arith.constant 0 : i32
    %c0_i32_1 = arith.constant 0 : i32
    return %c0_i32, %c0_i32_0 : i32, i32
  }
  func.func @transform_3(%arg0: i32) -> (i32, i32) {
    %c0_i32 = arith.constant 0 : i32
    %c0_i32_0 = arith.constant 0 : i32
    return %arg0, %c0_i32 : i32, i32
  }
}

</mosaic_0001>

<bundles_post_ra>
// kernel: hidden_forward.1
= control target key start
LH: loop header
LB: loop body
LE: loop exit
PB: predicated region body
PF: predicated region fallthrough
CT: control target
= control target key end

     0   :  { %8 = vsyncpa [#allocation3], 0  ;;  %s265_s0 = inlined_call_operand.hbm [shape: f32[8,1], index: 0, kind: input, shape index: {}]   ;;  %s266_s1 = inlined_call_operand.hbm [shape: f32[1,128], index: 1, kind: input, shape index: {}]   ;;  %s267_s2 = inlined_call_operand.hbm [shape: f32[1,128], index: 2, kind: input, shape index: {}]   ;;  %s268_s3 = inlined_call_operand.hbm [shape: f32[8,128], index: 3, kind: output, shape index: {}]  }
   0x1   :  { %9 = vsyncpa [#allocation6], 0 }
   0x2   :  { %10 = vsyncpa [#allocation4], 0  ;;  %s192_s12 = smov [#allocation5]   ;;  %s193_s14 = smov [#allocation2]  }
   0x3   :  { %s27_s13 = sshll.u32 %s192_s12, 4  ;;  %s17_s15 = sshll.u32 %s193_s14, 4  ;;  %s28_s13 = int_to_ptr.vmem [resolvable:$true] %s27_s13  ;;  %s18_s15 = int_to_ptr.vmem [resolvable:$true] %s17_s15 }
   0x4   :  { %s98_s18 = scalar_lea.hbm %s266_s1, 16 }
   0x5   :  { %p99_p0 = scmp.ne.s32.totalorder %s266_s1, %s98_s18  ;;  %p102_p1 = scmp.lt.u32.totalorder %s98_s18, %s266_s1 }
   0x7   :  { %p104_p2 = pnand %p102_p1, %p99_p0 }
   0x9   :  { %107 = shalt.err (!%p104_p2)
}
   0xa   :  { %s108_s23 = scalar_lea.vmem %s28_s13, 16  ;;  %s112_s24 = scalar_lea.vmem %s28_s13, 32 }
   0xb   :  { %p109_p3 = scmp.ne.s32.totalorder %s28_s13, %s108_s23  ;;  %p113_p4 = scmp.lt.s32.totalorder %s28_s13, %s28_s13 }
   0xc   :  { %p114_p5 = scmp.lt.s32.totalorder %s112_s24, %s108_s23 }
   0xe   :  { %p115_p6 = por %p114_p5, %p113_p4 }
  0x10   :  { %p116_p7 = pnand %p115_p6, %p109_p3 }
  0x12   :  { %119 = shalt.err (!%p116_p7)
}
  0x13   :  { %30 = dma.hbm_to_vmem [thread:$0]  %s266_s1, 16, %s28_s13, [#allocation6]  }
  0x14   :  { %s120_s29 = scalar_lea.hbm %s265_s0, 128 }
  0x15   :  { %p121_p8 = scmp.ne.s32.totalorder %s265_s0, %s120_s29  ;;  %p124_p9 = scmp.lt.u32.totalorder %s120_s29, %s265_s0 }
  0x17   :  { %p126_p10 = pnand %p124_p9, %p121_p8 }
  0x19   :  { %129 = shalt.err (!%p126_p10)
}
  0x1a   :  { %s130_s7 = scalar_lea.vmem %s18_s15, 128  ;;  %p135_p12 = scmp.lt.s32.totalorder %s18_s15, %s18_s15 }
  0x1b   :  { %p131_p11 = scmp.ne.s32.totalorder %s18_s15, %s130_s7  ;;  %p136_p13 = scmp.lt.s32.totalorder %s130_s7, %s130_s7 }
  0x1d   :  { %p137_p0 = por %p136_p13, %p135_p12 }
  0x1f   :  { %p138_p1 = pnand %p137_p0, %p131_p11 }
  0x21   :  { %141 = shalt.err (!%p138_p1)
}
  0x22   :  { %20 = dma.hbm_to_vmem [thread:$0]  %s265_s0, 128, %s18_s15, [#allocation3]  }
  0x23   :  { %s194_s9 = smov [#allocation7]   ;;  %s142_s13 = scalar_lea.hbm %s267_s2, 16 }
  0x24   :  { %s37_s10 = sshll.u32 %s194_s9, 4  ;;  %p143_p2 = scmp.ne.s32.totalorder %s267_s2, %s142_s13  ;;  %s38_s10 = int_to_ptr.vmem [resolvable:$true] %s37_s10 }
  0x25   :  { %p146_p3 = scmp.lt.u32.totalorder %s142_s13, %s267_s2 }
  0x27   :  { %p148_p4 = pnand %p146_p3, %p143_p2 }
  0x29   :  { %151 = shalt.err (!%p148_p4)
}
  0x2a   :  { %s152_s19 = scalar_lea.vmem %s38_s10, 16  ;;  %s156_s0 = scalar_lea.vmem %s38_s10, 32 }
  0x2b   :  { %p153_p5 = scmp.ne.s32.totalorder %s38_s10, %s152_s19  ;;  %p157_p6 = scmp.lt.s32.totalorder %s38_s10, %s38_s10 }
  0x2c   :  { %p158_p7 = scmp.lt.s32.totalorder %s156_s0, %s152_s19 }
  0x2e   :  { %p159_p8 = por %p158_p7, %p157_p6 }
  0x30   :  { %p160_p9 = pnand %p159_p8, %p153_p5 }
  0x32   :  { %163 = shalt.err (!%p160_p9)
}
  0x33   :  { %40 = dma.hbm_to_vmem [thread:$0]  %s267_s2, 16, %s38_s10, [#allocation6]  }
  0x34   :  { %186 = dma.done.wait [#allocation3], 128  }
  0x35   :  { %187 = vsyncadd [#allocation3], 4294967168 }
  0x36   :  { %188 = dma.done.wait [#allocation6], 32  }
  0x37   :  { %189 = vsyncadd [#allocation6], 4294967264  ;;  %v195_v0 = vmov 0   ;;  %v50_v1 = vld [vmem:[#allocation2] sm:$0xff]  ;;  %v90_v2 = vld [vmem:[#allocation5] ss:$0 sm:$0xff] }
  0x38   :  { %97 = vset.pattern.permute.xlu0 %v195_v0  ;;  %v91_v3 = vld [vmem:[#allocation7] ss:$0 sm:$0xff]  ;;  %s196_s21 = smov [#allocation8]  }
  0x39   :  { %55 = vperm.xlu0 %97, %v50_v1   ;;  %s80_s22 = sshll.u32 %s196_s21, 4  ;;  %s81_s22 = int_to_ptr.vmem [resolvable:$true] %s80_s22 }
  0x3a   :  { %s164_s23 = scalar_lea.vmem %s81_s22, 128  ;;  %p169_p11 = scmp.lt.s32.totalorder %s81_s22, %s81_s22 }
  0x3b   :  { %p165_p10 = scmp.ne.s32.totalorder %s81_s22, %s164_s23  ;;  %p170_p12 = scmp.lt.s32.totalorder %s164_s23, %s164_s23 }
  0x3d   :  { %p171_p13 = por %p170_p12, %p169_p11 }
  0x3f   :  { %p172_p0 = pnand %p171_p13, %p165_p10 }
  0xb8   :  { %v56_v4 = vpop.permute.xlu0 %55 }
  0xb9   :  { %v64_v5 = vmul.f32 %v90_v2, %v56_v4 }
  0xbb   :  { %v71_v6 = vadd.f32 %v91_v3, %v64_v5 }
  0xbd   :  { %v72_v7 = vmax.f32 %v71_v6, 0.0 }
  0xbf   :  { %73 = vst [vmem:[#allocation8] sm:$0xff] %v72_v7 }
  0xc0   :  { %175 = shalt.err (!%p172_p0)
}
  0xc1   :  { %s176_s25 = scalar_lea.hbm %s268_s3, 128 }
  0xc2   :  { %p177_p1 = scmp.ne.s32.totalorder %s268_s3, %s176_s25  ;;  %p180_p2 = scmp.lt.u32.totalorder %s176_s25, %s268_s3 }
  0xc4   :  { %p182_p3 = pnand %p180_p2, %p177_p1 }
  0xc6   :  { %185 = shalt.err (!%p182_p3)
}
  0xc7   :  { %83 = dma.vmem_to_hbm [thread:$0]  %s81_s22, 128, %s268_s3, [#allocation4]  }
  0xc8   :  { %190 = dma.done.wait [#allocation4], 128  }
  0xc9   :  { %191 = vsyncadd [#allocation4], 4294967168 }
  0xca   :  { %87 = vsyncpa [#allocation3], 1 }
  0xcb   :  { %88 = vsyncpa [#allocation6], 1 }
  0xcc   :  { %89 = vsyncpa [#allocation4], 1 }

</bundles_post_ra>
